<compile_context>
chip_gen: v6e
topology: v6e:2x2x1
jax: 0.10.0
libtpu: 0.0.40
codegen_flags: <defaults>
</compile_context>

<pallas_src>
import functools

import jax
import jax.numpy as jnp
from jax.experimental import pallas as pl
from jax.experimental.pallas import tpu as pltpu

LN_EPS = 1e-5  # PyTorch nn.LayerNorm default


def _round_up(x, m):
    return ((x + m - 1) // m) * m


def disc_trunk_kernel(x_ref, w_ref, p_ref, o_ref, acc_ref, *, inv_f):
    """Grid = (batch tiles, K tiles). K is the reduction (last) axis."""
    k = pl.program_id(1)

    @pl.when(k == 0)
    def _init():
        acc_ref[...] = jnp.zeros_like(acc_ref)

    # MXU matmul in the storage dtype (bf16-native when inputs are bf16),
    # accumulated in f32.
    acc_ref[...] += jnp.dot(
        x_ref[...], w_ref[...], preferred_element_type=jnp.float32
    )

    @pl.when(k == pl.num_programs(1) - 1)
    def _finalize():
        bias = p_ref[0:1, :]   # (1, F_pad) f32
        gamma = p_ref[1:2, :]
        beta = p_ref[2:3, :]

        h = acc_ref[...] + bias            # padded feature cols stay exactly 0
        # One-pass LayerNorm stats. Padded (zero) columns contribute nothing to
        # the sums and inv_f = 1/real_feature_dim, so stats equal the unpadded
        # ones. Biased variance matches torch.nn.LayerNorm.
        mean = jnp.sum(h, axis=-1, keepdims=True) * inv_f
        mean_sq = jnp.sum(h * h, axis=-1, keepdims=True) * inv_f
        var = mean_sq - mean * mean
        h_norm = (h - mean) * jax.lax.rsqrt(var + LN_EPS)
        o_ref[...] = jnp.tanh(h_norm * gamma + beta).astype(o_ref.dtype)


def disc_trunk(obs, w, b, gamma, beta, *, block_b=256, block_k=512, out_dtype=None):
    """obs: (B, repr_dim); w: (repr_dim, feature_dim); b/gamma/beta: (feature_dim,)."""
    B, repr_dim = obs.shape
    rd_w, feature_dim = w.shape
    assert rd_w == repr_dim, "weight/obs repr_dim mismatch"
    out_dtype = obs.dtype if out_dtype is None else out_dtype

    # Lane-dense output: pad the feature axis to a multiple of 128.
    f_pad = _round_up(feature_dim, 128)

    # Batch tile: as large as possible (<= block_b), multiple of 8; pad batch.
    bb = min(_round_up(B, 8), _round_up(block_b, 8))
    b_pad = _round_up(B, bb)

    # K tile: full repr_dim if it is small, otherwise a 128-multiple chunk.
    if repr_dim <= block_k:
        bk = repr_dim
    else:
        bk = _round_up(block_k, 128)
    k_pad = _round_up(repr_dim, bk)

    obs_p = obs
    if (b_pad, k_pad) != (B, repr_dim):
        obs_p = jnp.pad(obs, ((0, b_pad - B), (0, k_pad - repr_dim)))
    w_p = w
    if (k_pad, f_pad) != (repr_dim, feature_dim):
        w_p = jnp.pad(w, ((0, k_pad - repr_dim), (0, f_pad - feature_dim)))

    # Stack bias / gamma / beta into one lane-dense (3, F_pad) block.
    # Padded columns are 0 => padded outputs are tanh(0)=0 and get sliced off.
    params = jnp.zeros((3, f_pad), jnp.float32)
    params = params.at[0, :feature_dim].set(b.astype(jnp.float32))
    params = params.at[1, :feature_dim].set(gamma.astype(jnp.float32))
    params = params.at[2, :feature_dim].set(beta.astype(jnp.float32))

    nb = b_pad // bb
    nk = k_pad // bk
    kernel = functools.partial(disc_trunk_kernel, inv_f=1.0 / feature_dim)

    out = pl.pallas_call(
        kernel,
        out_shape=jax.ShapeDtypeStruct((b_pad, f_pad), out_dtype),
        grid_spec=pltpu.PrefetchScalarGridSpec(
            num_scalar_prefetch=0,
            grid=(nb, nk),
            in_specs=[
                pl.BlockSpec((bb, bk), lambda i, k: (i, k)),       # activations
                pl.BlockSpec((bk, f_pad), lambda i, k: (k, 0)),    # weight slab
                pl.BlockSpec((3, f_pad), lambda i, k: (0, 0)),     # bias/gamma/beta
            ],
            out_specs=pl.BlockSpec((bb, f_pad), lambda i, k: (i, 0)),
            scratch_shapes=[pltpu.VMEM((bb, f_pad), jnp.float32)],  # f32 accumulator
        ),
        compiler_params=pltpu.CompilerParams(
            dimension_semantics=("parallel", "arbitrary"),
            vmem_limit_bytes=48 * 1024 * 1024,
        ),
    )(obs_p, w_p, params)

    return out[:B, :feature_dim]


def reference(obs, w, b, gamma, beta):
    h = obs.astype(jnp.float32) @ w.astype(jnp.float32) + b.astype(jnp.float32)
    mean = jnp.mean(h, axis=-1, keepdims=True)
    var = jnp.mean((h - mean) ** 2, axis=-1, keepdims=True)
    h = (h - mean) / jnp.sqrt(var + LN_EPS)
    h = h * gamma + beta
    return jnp.tanh(h)


if __name__ == "__main__":
    # Small DrQ-style shapes; deliberately NOT multiples of 8/128 so the
    # batch-padding, K-tiling and lane-padding paths are all exercised.
    B, repr_dim, feature_dim = 10, 200, 50

    key = jax.random.PRNGKey(0)
    k_obs, k_w, k_b, k_g, k_be = jax.random.split(key, 5)

    obs = jax.random.normal(k_obs, (B, repr_dim), jnp.float32)
    w = jax.random.normal(k_w, (repr_dim, feature_dim), jnp.float32) / jnp.sqrt(repr_dim)
    b = jax.random.normal(k_b, (feature_dim,), jnp.float32) * 0.1
    gamma = 1.0 + 0.1 * jax.random.normal(k_g, (feature_dim,), jnp.float32)
    beta = 0.1 * jax.random.normal(k_be, (feature_dim,), jnp.float32)

    # f32 path (block_k=128 -> 2 K-steps, exercising the accumulator).
    out = disc_trunk(obs, w, b, gamma, beta, block_b=256, block_k=128)
    out = jax.block_until_ready(out)
    ref = reference(obs, w, b, gamma, beta)
    assert out.shape == (B, feature_dim)
    err = float(jnp.max(jnp.abs(out - ref)))
    assert jnp.allclose(out, ref, atol=5e-5, rtol=5e-5), f"max err {err}"

    # bf16 storage path (memory-bandwidth win on v6e/v7x): bf16 in HBM/MXU,
    # f32 accumulation + LayerNorm inside the kernel, bf16 output.
    out_bf16 = disc_trunk(
        obs.astype(jnp.bfloat16), w.astype(jnp.bfloat16), b, gamma, beta,
        block_b=256, block_k=128,
    )
    out_bf16 = jax.block_until_ready(out_bf16)
    assert out_bf16.shape == (B, feature_dim)
    assert out_bf16.dtype == jnp.bfloat16
    out_bf16_f32 = out_bf16.astype(jnp.float32)
    assert bool(jnp.all(jnp.isfinite(out_bf16_f32)))
    assert jnp.allclose(out_bf16_f32, ref, atol=0.1), "bf16 path mismatch"

    print("KERNEL_OK")
</pallas_src>

<mosaic_0001>
module attributes {stable_mosaic.version = 11 : i64} {
  func.func @disc_trunk_kernel(%arg0: i32, %arg1: i32, %arg2: memref<16x128xf32, #tpu.memory_space<vmem>>, %arg3: memref<128x128xf32, #tpu.memory_space<vmem>>, %arg4: memref<3x128xf32, #tpu.memory_space<vmem>>, %arg5: memref<16x128xf32, #tpu.memory_space<vmem>>, %arg6: memref<16x128xf32, #tpu.memory_space<vmem>>) attributes {dimension_semantics = [#tpu.dimension_semantics<parallel>, #tpu.dimension_semantics<arbitrary>], iteration_bounds = array<i64: 1, 2>, scalar_prefetch = 0 : i64, scratch_operands = 1 : i64, tpu.core_type = #tpu.core_type<tc>, window_params = [{transform_indices = @transform_0, window_bounds = array<i64: 16, 128>}, {transform_indices = @transform_1, window_bounds = array<i64: 128, 128>}, {pipeline_mode = #tpu.pipeline_mode<synchronous>, transform_indices = @transform_2, window_bounds = array<i64: 3, 128>}, {transform_indices = @transform_3, window_bounds = array<i64: 16, 128>}]} {
    %c0_i32 = arith.constant 0 : i32
    %0 = arith.cmpi eq, %arg1, %c0_i32 : i32
    %1 = arith.extui %0 : i1 to i32
    %c0_i32_0 = arith.constant 0 : i32
    %2 = arith.cmpi ne, %1, %c0_i32_0 : i32
    scf.if %2 {
      %cst_9 = arith.constant 0.000000e+00 : f32
      %12 = vector.broadcast %cst_9 : f32 to vector<16x128xf32>
      %c0_10 = arith.constant 0 : index
      %c0_11 = arith.constant 0 : index
      %13 = vector.load %arg6[%c0_10, %c0_11] : memref<16x128xf32, #tpu.memory_space<vmem>>, vector<16x128xf32>
      tpu.vector_store %arg6[%c0_10, %c0_11], %12 {strides = array<i32>} : memref<16x128xf32, #tpu.memory_space<vmem>>, vector<16x128xf32>,
    } else {
    }
    %c0 = arith.constant 0 : index
    %c0_1 = arith.constant 0 : index
    %3 = vector.load %arg6[%c0, %c0_1] : memref<16x128xf32, #tpu.memory_space<vmem>>, vector<16x128xf32>
    %c0_2 = arith.constant 0 : index
    %c0_3 = arith.constant 0 : index
    %4 = vector.load %arg2[%c0_2, %c0_3] : memref<16x128xf32, #tpu.memory_space<vmem>>, vector<16x128xf32>
    %c0_4 = arith.constant 0 : index
    %c0_5 = arith.constant 0 : index
    %5 = vector.load %arg3[%c0_4, %c0_5] : memref<128x128xf32, #tpu.memory_space<vmem>>, vector<128x128xf32>
    %cst = arith.constant dense<0.000000e+00> : vector<16x128xf32>
    %6 = tpu.matmul %4, %5, %cst {dimension_numbers = #tpu.dot_dimension_numbers<[1], [0], [0], [1], [0, 0, 1, 1], [], []>} : vector<16x128xf32>, vector<128x128xf32>, vector<16x128xf32> -> vector<16x128xf32>
    %7 = arith.addf %3, %6 : vector<16x128xf32>
    %c0_6 = arith.constant 0 : index
    %c0_7 = arith.constant 0 : index
    %8 = vector.load %arg6[%c0_6, %c0_7] : memref<16x128xf32, #tpu.memory_space<vmem>>, vector<16x128xf32>
    tpu.vector_store %arg6[%c0_6, %c0_7], %7 {strides = array<i32>} : memref<16x128xf32, #tpu.memory_space<vmem>>, vector<16x128xf32>,
    %c1_i32 = arith.constant 1 : i32
    %9 = arith.cmpi eq, %arg1, %c1_i32 : i32
    %10 = arith.extui %9 : i1 to i32
    %c0_i32_8 = arith.constant 0 : i32
    %11 = arith.cmpi ne, %10, %c0_i32_8 : i32
    scf.if %11 {
      %c0_9 = arith.constant 0 : index
      %c0_10 = arith.constant 0 : index
      %12 = vector.load %arg4[%c0_9, %c0_10] : memref<3x128xf32, #tpu.memory_space<vmem>>, vector<1x128xf32>
      %c1 = arith.constant 1 : index
      %c0_11 = arith.constant 0 : index
      %13 = vector.load %arg4[%c1, %c0_11] : memref<3x128xf32, #tpu.memory_space<vmem>>, vector<1x128xf32>
      %c2 = arith.constant 2 : index
      %c0_12 = arith.constant 0 : index
      %14 = vector.load %arg4[%c2, %c0_12] : memref<3x128xf32, #tpu.memory_space<vmem>>, vector<1x128xf32>
      %c0_13 = arith.constant 0 : index
      %c0_14 = arith.constant 0 : index
      %15 = vector.load %arg6[%c0_13, %c0_14] : memref<16x128xf32, #tpu.memory_space<vmem>>, vector<16x128xf32>
      %16 = vector.broadcast %12 : vector<1x128xf32> to vector<16x128xf32>
      %17 = arith.addf %15, %16 : vector<16x128xf32>
      %cst_15 = arith.constant dense<0.000000e+00> : vector<16xf32>
      %18 = vector.multi_reduction <add>, %17, %cst_15 [1] : vector<16x128xf32> to vector<16xf32>
      %19 = vector.shape_cast %18 : vector<16xf32> to vector<16x1xf32>
      %cst_16 = arith.constant 2.000000e-02 : f32
      %20 = vector.broadcast %cst_16 : f32 to vector<16x1xf32>
      %21 = arith.mulf %19, %20 : vector<16x1xf32>
      %22 = arith.mulf %17, %17 : vector<16x128xf32>
      %cst_17 = arith.constant dense<0.000000e+00> : vector<16xf32>
      %23 = vector.multi_reduction <add>, %22, %cst_17 [1] : vector<16x128xf32> to vector<16xf32>
      %24 = vector.shape_cast %23 : vector<16xf32> to vector<16x1xf32>
      %cst_18 = arith.constant 2.000000e-02 : f32
      %25 = vector.broadcast %cst_18 : f32 to vector<16x1xf32>
      %26 = arith.mulf %24, %25 : vector<16x1xf32>
      %27 = arith.mulf %21, %21 : vector<16x1xf32>
      %28 = arith.subf %26, %27 : vector<16x1xf32>
      %29 = vector.broadcast %21 : vector<16x1xf32> to vector<16x128xf32>
      %30 = arith.subf %17, %29 : vector<16x128xf32>
      %cst_19 = arith.constant 9.99999974E-6 : f32
      %31 = vector.broadcast %cst_19 : f32 to vector<16x1xf32>
      %32 = arith.addf %28, %31 : vector<16x1xf32>
      %33 = math.rsqrt %32 : vector<16x1xf32>
      %34 = vector.broadcast %33 : vector<16x1xf32> to vector<16x128xf32>
      %35 = arith.mulf %30, %34 : vector<16x128xf32>
      %36 = vector.broadcast %13 : vector<1x128xf32> to vector<16x128xf32>
      %37 = arith.mulf %35, %36 : vector<16x128xf32>
      %38 = vector.broadcast %14 : vector<1x128xf32> to vector<16x128xf32>
      %39 = arith.addf %37, %38 : vector<16x128xf32>
      %40 = math.tanh %39 : vector<16x128xf32>
      %c0_20 = arith.constant 0 : index
      %c0_21 = arith.constant 0 : index
      %41 = vector.load %arg5[%c0_20, %c0_21] : memref<16x128xf32, #tpu.memory_space<vmem>>, vector<16x128xf32>
      tpu.vector_store %arg5[%c0_20, %c0_21], %40 {strides = array<i32>} : memref<16x128xf32, #tpu.memory_space<vmem>>, vector<16x128xf32>,
    } else {
    }
    return
  }
  func.func @transform_0(%arg0: i32, %arg1: i32) -> (i32, i32) {
    %c0_i32 = arith.constant 0 : i32
    return %arg0, %arg1 : i32, i32
  }
  func.func @transform_1(%arg0: i32, %arg1: i32) -> (i32, i32) {
    %c0_i32 = arith.constant 0 : i32
    %c0_i32_0 = arith.constant 0 : i32
    return %arg1, %c0_i32 : i32, i32
  }
  func.func @transform_2(%arg0: i32, %arg1: i32) -> (i32, i32) {
    %c0_i32 = arith.constant 0 : i32
    %c0_i32_0 = arith.constant 0 : i32
    %c0_i32_1 = arith.constant 0 : i32
    return %c0_i32, %c0_i32_0 : i32, i32
  }
  func.func @transform_3(%arg0: i32, %arg1: i32) -> (i32, i32) {
    %c0_i32 = arith.constant 0 : i32
    %c0_i32_0 = arith.constant 0 : i32
    return %arg0, %c0_i32 : i32, i32
  }
}

</mosaic_0001>

<bundles_post_ra>
// kernel: tpu_custom_call.1
= control target key start
LH: loop header
LB: loop body
LE: loop exit
PB: predicated region body
PF: predicated region fallthrough
CT: control target
= control target key end

     0   :  { %s1058_s0 = inlined_call_operand.hbm [shape: f32[16,256], index: 0, kind: input, shape index: {}]   ;;  %s1059_s1 = inlined_call_operand.hbm [shape: f32[256,128], index: 1, kind: input, shape index: {}]   ;;  %s1060_s2 = inlined_call_operand.hbm [shape: f32[3,128], index: 2, kind: input, shape index: {}]   ;;  %s1061_s3 = inlined_call_operand.hbm [shape: f32[16,128], index: 3, kind: output, shape index: {}]  }
   0x1   :  { %1065 = sst [smem:[#allocation15_spill]] %s1058_s0 }
   0x2   :  { %1066 = sst [smem:[#allocation16_spill]] %s1060_s2 }
   0x3   :  { %8 = vsyncpa [#allocation4], 0 }
   0x4   :  { %10 = vsyncpa [#allocation4 + $0x1], 0 }
   0x5   :  { %11 = vsyncpa [#allocation7], 0 }
   0x6   :  { %13 = vsyncpa [#allocation7 + $0x1], 0 }
   0x7   :  { %14 = vsyncpa [#allocation5], 0  ;;  %s890_s12 = smov 0   ;;  %s892_s13 = smov 0  }
   0x8   :  { %s894_s14 = smov 0   ;;  %s896_s15 = smov 0  }
   0x9   :  { %s898_s16 = smov 0   ;;  %s900_s17 = smov 0  }
   0xa LB: > { %s919_s18 = sadd.s32 4294967295, %s858_s17   ;;  %s41_s19 = sadd.s32 1, %s846_s14  ;;  %s858_s17 = sphi %s900_s17, %s20_s17   ;;  %s854_s16 = sphi %s898_s16, %s1081_s16   ;;  %s850_s15 = sphi %s896_s15, %s1080_s15   ;;  %s846_s14 = sphi %s894_s14, %s1079_s14   ;;  %s842_s13 = sphi %s892_s13, %s1078_s13   ;;  %s838_s12 = sphi %s890_s12, %s1077_s12  }
   0xb   : > { %p48_p0 = scmp.ne.s32.totalorder %s846_s14, %s842_s13  ;;  %p49_p1 = scmp.eq.s32.totalorder %s858_s17, 0 }
   0xc   : > { %p54_p2 = scmp.ne.s32.totalorder %s842_s13, %s838_s12  ;;  %p55_p3 = scmp.eq.s32.totalorder %s919_s18, 0 }
   0xd   : > { %p50_p4 = por %p49_p1, %p48_p0  ;;  %p523_p5 = scmp.ge.s32.totalorder %s858_s17, 1 }
   0xe   : > { %p930_p6 = por %p55_p3, %p54_p2  ;;  %p138_p7 = scmp.lt.s32.totalorder %s858_s17, 3 }
   0xf   : > { %s860_s22 = smov [#allocation8]   ;;  %p622_p10 = scmp.lt.s32.totalorder %s858_s17, 2 }
  0x10   : > { %s1067_s20 = scalar_select %p930_p6, 1, 0 }
  0x11   : > { %p935_p8 = pnand %p523_p5, %p138_p7  ;;  %s151_s23 = sshll.u32 %s860_s22, 4  ;;  %s152_s23 = int_to_ptr.vmem [resolvable:$true] %s151_s23 }
  0x12   : > { %s943_s24 = sand.u32 1, %s846_s14   ;;  %p947_p12 = pnand %p622_p10, %p50_p4 }
  0x13   : > { %s1068_s21 = scalar_select %p935_p8, 1, 0 }
  0x14   : > { %p610_p9 = pneg %p935_p8  ;;  %s701_s26 = scalar_lea.vmem %s152_s23, 64 }
  0x15   : > { %p702_p0 = scmp.ne.s32.totalorder %s152_s23, %s701_s26  ;;  %p709_p5 = scmp.lt.s32.totalorder %s152_s23, %s152_s23 }
  0x16   : > { %p611_p11 = pnand %p610_p9, %p55_p3  ;;  %p710_p7 = scmp.lt.s32.totalorder %s701_s26, %s701_s26 }
  0x18   : > { %p692_p13 = pneg %p611_p11  ;;  %p711_p6 = por %p710_p7, %p709_p5 }
  0x1a   : > { %p704_p1 = pnand %p702_p0, %p692_p13 }
  0x1c   : > { %p705_p2 = pneg %p704_p1 }
  0x1e   : > { %p712_p8 = pnand %p711_p6, %p705_p2 }
  0x20   : > { %715 = shalt.err (!%p712_p8)
}
  0x21   : > { %s1070_s2 = sld [smem:[#allocation16_spill]]  ;;  %s29_s29 = sadd.s32 1, %s854_s16 }
  0x22   : > { %s526_s30 = sshll.u32 %s943_s24, 4  ;;  %p30_p4 = scmp.ge.s32.totalorder %s29_s29, 2 }
  0x23   : > { %s527_s4 = sshll.u32 %s854_s16, 7  ;;  %s166_s5 = scalar_lea.vmem [#allocation3], %s526_s30 }
  0x24   : > { %s175_s6 = sshll.u32 %s166_s5, 4  ;;  %s1083_s29 = smov (%p30_p4, %s29_s29), 0  ;;  %s176_s6 = int_to_ptr.vmem [resolvable:$true] %s175_s6 }
  0x25   : > { %1071 = sst [smem:[#allocation14_spill]] %s1083_s29  ;;  %s37_s10 = ssub.s32 %s854_s16, %s1083_s29 }
  0x26   : > { %s1072_s0 = sld [smem:[#allocation15_spill]]  ;;  %p39_p6 = scmp.eq.s32.totalorder %s37_s10, 0 }
  0x27   : > { %613 = dma.hbm_to_vmem [thread:$0]  (!%p611_p11), %s1070_s2, 64, %s152_s23, [#allocation7]  }
  0x28   : > { %s185_s11 = sand.u32 1, %s858_s17   ;;  %s163_s22 = scalar_lea.sflag [#allocation4], %s943_s24 }
  0x29   : > { %s968_s12 = scalar_select %p39_p6, %s846_s14, %s41_s19  }
  0x2a   : > { %p718_p8 = pneg %p947_p12  ;;  %s729_s23 = scalar_lea.vmem %s176_s6, 256 }
  0x2b   : > { %p730_p9 = scmp.ne.s32.totalorder %s176_s6, %s729_s23  ;;  %s861_s26 = smov [#allocation3]  }
  0x2c   : > { %s174_s9 = scalar_lea.hbm %s1072_s0, %s527_s4  ;;  %s734_s27 = sshll.u32 %s861_s26, 4  ;;  %s735_s27 = int_to_ptr.vmem [resolvable:$false] %s734_s27 }
  0x2d   : > { %p732_p10 = pnand %p730_p9, %p718_p8  ;;  %s736_s28 = scalar_lea.vmem %s735_s27, 512 }
  0x2e   : > { %p737_p13 = scmp.lt.s32.totalorder %s176_s6, %s735_s27  ;;  %p738_p0 = scmp.lt.s32.totalorder %s736_s28, %s729_s23 }
  0x2f   : > { %p733_p11 = pneg %p732_p10 }
  0x30   : > { %p739_p1 = por %p738_p0, %p737_p13 }
  0x32   : > { %p740_p2 = pnand %p739_p1, %p733_p11 }
  0x34   : > { %743 = shalt.err (!%p740_p2)
}
  0x35   : > { %s862_s19 = smov 256   ;;  %s863_s30 = smov 128  }
  0x36   : > { %s864_s4 = smov 8   ;;  %s528_s5 = sshll.u32 %s943_s24, 7 }
  0x37   : > { %617 = dma.hbm_to_vmem [thread:$0]  (!%p947_p12), %s174_s9, 256, %s176_s6, %s163_s22, %s862_s19, %s863_s30, %s864_s4  }
  0x38   : > { %s544_s7 = sshll.u32 %s854_s16, 11  ;;  %s189_s27 = scalar_lea.vmem [#allocation6], %s528_s5 }
  0x39   : > { %s195_s26 = scalar_lea.hbm %s1059_s1, %s544_s7  ;;  %s196_s23 = sshll.u32 %s189_s27, 4  ;;  %s197_s23 = int_to_ptr.vmem [resolvable:$true] %s196_s23 }
  0x3a   : > { %s186_s28 = scalar_lea.sflag [#allocation7], %s185_s11  ;;  %s757_s0 = scalar_lea.vmem %s197_s23, 2048 }
  0x3b   : > { %p758_p5 = scmp.ne.s32.totalorder %s197_s23, %s757_s0  ;;  %s865_s2 = smov [#allocation6]  }
  0x3c   : > { %s762_s29 = sshll.u32 %s865_s2, 4  ;;  %s763_s29 = int_to_ptr.vmem [resolvable:$false] %s762_s29 }
  0x3d   : > { %p760_p7 = pnand %p758_p5, %p718_p8  ;;  %s764_s6 = scalar_lea.vmem %s763_s29, 4096 }
  0x3e   : > { %p765_p6 = scmp.lt.s32.totalorder %s197_s23, %s763_s29  ;;  %p766_p9 = scmp.lt.s32.totalorder %s764_s6, %s757_s0 }
  0x3f   : > { %p761_p4 = pneg %p760_p7 }
  0x40   : > { %p767_p10 = por %p766_p9, %p765_p6 }
  0x42   : > { %p768_p11 = pnand %p767_p10, %p761_p4 }
  0x44   : > { %771 = shalt.err (!%p768_p11)
}
  0x45   : > { %620 = dma.hbm_to_vmem [thread:$0]  (!%p947_p12), %s195_s26, 2048, %s197_s23, %s186_s28, %s863_s30, %s863_s30, %s864_s4  }
  0x46   : > { %p1073_p13 = scmp.ne.s32.totalorder %s1068_s21, 0 }
  0x47   : > { %s210_s24 = sand.u32 (!%p1073_p13), 1, %s842_s13   ;;  %p1074_p8 = scmp.ne.s32.totalorder (!%p1073_p13), %s1067_s20, 0 }
  0x48   : > { %208 = sbr.rel (%p1073_p13) target bundleno = 533 (0x215), region = 32  ;;  %s532_s9 = sshll.u32 (!%p1073_p13), %s210_s24, 4 }
  0x49   : > { %s211_s11 = scalar_lea.sflag (!%p1073_p13), [#allocation4], %s210_s24  ;;  %s991_s22 = scalar_lea.vmem (!%p1073_p13), [#allocation3], %s532_s9 }
  0x4d   : > { %821 = dma.done.wait (%p1074_p8), %s211_s11, 256  }
  0x4e   : > { %823 = vsyncadd (%p1074_p8), %s211_s11, 4294967040  ;;  %s219_s0 = sand.u32 1, %s919_s18   ;;  %s533_s2 = sshll.u32 %s210_s24, 7 }
  0x4f   : > { %s220_s25 = scalar_lea.sflag [#allocation7], %s219_s0  ;;  %s998_s29 = scalar_lea.vmem [#allocation6], %s533_s2 }
  0x50   : > { %825 = dma.done.wait (%p1074_p8), %s220_s25, 2048  }
  0x51   : > { %827 = vsyncadd (%p1074_p8), %s220_s25, 4294965248 }
  0x52   : > { %829 = dma.done.wait (%p55_p3), [#allocation7], 64  }
  0x53   : > { %831 = vsyncadd (%p55_p3), [#allocation7], 4294967232  ;;  %p535_p12 = scmp.ne.s32.totalorder %s850_s15, 0 }
  0x55   : > { %256 = sbr.rel (%p535_p12) target bundleno = 92 (0x5c), region = 48 }
  0x5a   : > { %v866_v0 = vmov 0.0  }
  0x5b   : > { %257 = vst [vmem:[#allocation2] sm:$0xff] %v866_v0  ;;  %258 = vst [vmem:[#allocation2 + $0x8] sm:$0xff] %v866_v0 }
  0x5c PF: > { %v278_v1 = vld [vmem:[%s998_s29 + $0x78] sm:$0xff]  ;;  %v277_v2 = vld [vmem:[%s998_s29 + $0x70] sm:$0xff]  ;;  %v276_v3 = vld [vmem:[%s998_s29 + $0x68] sm:$0xff]  ;;  %p536_p3 = scmp.ne.s32.totalorder %s850_s15, 1 }
  0x5d   : > { %563 = vmatprep.subr.mxu0 %v278_v1  ;;  %v275_v4 = vld [vmem:[%s998_s29 + $0x60] sm:$0xff]  ;;  %v274_v6 = vld [vmem:[%s998_s29 + $0x58] sm:$0xff]  ;;  %v273_v7 = vld [vmem:[%s998_s29 + $0x50] sm:$0xff] }
  0x5e   : > { %564 = vmatpush3.msra.mxu0 %v278_v1  ;;  %v261_v5 = vld [vmem:[%s991_s22] sm:$0xff]  ;;  %v272_v8 = vld [vmem:[%s998_s29 + $0x48] sm:$0xff]  ;;  %v270_v10 = vld [vmem:[%s998_s29 + $0x38] sm:$0xff] }
  0x5f   : > { %565 = vmatprep.subr.mxu0 %v277_v2  ;;  %595 = vmatprep.mubr.f32.mxu0 %v261_v5  ;;  %v271_v9 = vld [vmem:[%s998_s29 + $0x40] sm:$0xff]  ;;  %v269_v11 = vld [vmem:[%s998_s29 + $0x30] sm:$0xff]  ;;  %v268_v12 = vld [vmem:[%s998_s29 + $0x28] sm:$0xff] }
  0x60   : > { %566 = vmatpush3.msra.mxu0 %v277_v2  ;;  %v267_v13 = vld [vmem:[%s998_s29 + $0x20] sm:$0xff]  ;;  %v266_v14 = vld [vmem:[%s998_s29 + $0x18] sm:$0xff]  ;;  %v265_v15 = vld [vmem:[%s998_s29 + $0x10] sm:$0xff] }
  0x61   : > { %567 = vmatprep.subr.mxu0 %v276_v3  ;;  %v264_v16 = vld [vmem:[%s998_s29 + $0x8] sm:$0xff]  ;;  %v263_v17 = vld [vmem:[%s998_s29] sm:$0xff] }
  0x62   : > { %568 = vmatpush3.msra.mxu0 %v276_v3  ;;  %v262_v18 = vld [vmem:[%s991_s22 + $0x8] sm:$0xff]  ;;  %v259_v21 = vld [vmem:[#allocation2] sm:$0xff] }
  0x63   : > { %569 = vmatprep.subr.mxu0 %v275_v4  ;;  %v260_v19 = vld [vmem:[#allocation2 + $0x8] sm:$0xff] }
  0x64   : > { %570 = vmatpush3.msra.mxu0 %v275_v4 }
  0x65   : > { %571 = vmatprep.subr.mxu0 %v274_v6 }
  0x66   : > { %572 = vmatpush3.msra.mxu0 %v274_v6 }
  0x67   : > { %573 = vmatprep.subr.mxu0 %v273_v7 }
  0x68   : > { %574 = vmatpush3.msra.mxu0 %v273_v7 }
  0x69   : > { %575 = vmatprep.subr.mxu0 %v272_v8 }
  0x6a   : > { %576 = vmatpush3.msra.mxu0 %v272_v8 }
  0x6b   : > { %577 = vmatprep.subr.mxu0 %v271_v9 }
  0x6c   : > { %578 = vmatpush3.msra.mxu0 %v271_v9 }
  0x6d   : > { %579 = vmatprep.subr.mxu0 %v270_v10 }
  0x6e   : > { %580 = vmatpush3.msra.mxu0 %v270_v10 }
  0x6f   : > { %581 = vmatprep.subr.mxu0 %v269_v11 }
  0x70   : > { %582 = vmatpush3.msra.mxu0 %v269_v11 }
  0x71   : > { %583 = vmatprep.subr.mxu0 %v268_v12 }
  0x72   : > { %584 = vmatpush3.msra.mxu0 %v268_v12 }
  0x73   : > { %585 = vmatprep.subr.mxu0 %v267_v13 }
  0x74   : > { %586 = vmatpush3.msra.mxu0 %v267_v13 }
  0x75   : > { %587 = vmatprep.subr.mxu0 %v266_v14 }
  0x76   : > { %588 = vmatpush3.msra.mxu0 %v266_v14 }
  0x77   : > { %589 = vmatprep.subr.mxu0 %v265_v15 }
  0x78   : > { %590 = vmatpush3.msra.mxu0 %v265_v15 }
  0x79   : > { %591 = vmatprep.subr.mxu0 %v264_v16 }
  0x7a   : > { %592 = vmatpush3.msra.mxu0 %v264_v16 }
  0x7b   : > { %593 = vmatprep.subr.mxu0 %v263_v17 }
  0x7c   : > { %594 = vmatpush3.msra.mxu0 %v263_v17 }
  0x7d   : > { %596 = vmatmul.mubr.f32.vlgmr.msra.gmra.mxu0 %v262_v18 }
 0x13d   : > { %v597_v20 = vpop.f32.mrf.mxu0 }
 0x13e   : > { %v355_v22 = vadd.f32 %v597_v20, %v260_v19  ;;  %361 = sbr.rel (%p536_p3) target bundleno = 517 (0x205), region = 52 }
 0x13f   : > { %v345_v23 = vpop.f32.mrf.mxu0 }
 0x140   : > { %357 = vst [vmem:[#allocation2 + $0x8] sm:$0xff] %v355_v22  ;;  %v354_v24 = vadd.f32 %v345_v23, %v259_v21 }
 0x142   : > { %356 = vst [vmem:[#allocation2] sm:$0xff] %v354_v24 }
 0x143   : > { %v537_v25 = vld [vmem:[#allocation8] ss:$0 sm:$0xff]  ;;  %v538_v48 = vld [vmem:[#allocation8 + $0x1] ss:$0 sm:$0xff]  ;;  %v539_v50 = vld [vmem:[#allocation8 + $0x2] ss:$0 sm:$0xff] }
 0x147   : > { %v366_v27 = vld [vmem:[#allocation2 + $0x8] sm:$0xff] }
 0x148   : > { %v372_v29 = vadd.f32 %v537_v25, %v366_v27 }
 0x149   : > { %v365_v26 = vld [vmem:[#allocation2] sm:$0xff] }
 0x14a   : > { %v371_v28 = vadd.f32 %v537_v25, %v365_v26  ;;  %v380_v31 = vmul.f32 %v372_v29, %v372_v29 }
 0x14c   : > { %373 = vadd.xlane.f32.xlu0 %v371_v28  ;;  %v379_v30 = vmul.f32 %v371_v28, %v371_v28 }
 0x14e   : > { %381 = vadd.xlane.f32.xlu1 %v379_v30 }
 0x150   : > { %375 = vadd.xlane.f32.xlu0 %v372_v29 }
 0x152   : > { %383 = vadd.xlane.f32.xlu1 %v380_v31 }
 0x1d5   : > { %v374_v32 = vpop.xlane.xlu0 %373 }
 0x1d6   : > { %v377_v33 = vmul.f32 0.02, %v374_v32 }
 0x1d7   : > { %v382_v34 = vpop.xlane.xlu1 %381 }
 0x1d8   : > { %v387_v35 = vmul.f32 %v377_v33, %v377_v33  ;;  %v385_v36 = vmul.f32 0.02, %v382_v34  ;;  %v391_v46 = vsub.f32 %v371_v28, %v377_v33 }
 0x1d9   : > { %v376_v37 = vpop.xlane.xlu0 %375 }
 0x1da   : > { %v389_v38 = vsub.f32 %v385_v36, %v387_v35  ;;  %v378_v39 = vmul.f32 0.02, %v376_v37 }
 0x1db   : > { %v384_v40 = vpop.xlane.xlu1 %383 }
 0x1dc   : > { %v393_v41 = vadd.f32 1e-05, %v389_v38  ;;  %v388_v42 = vmul.f32 %v378_v39, %v378_v39  ;;  %v386_v43 = vmul.f32 0.02, %v384_v40  ;;  %v392_v52 = vsub.f32 %v372_v29, %v378_v39 }
 0x1de   : > { %682 = vrsqrt.f32 %v393_v41  ;;  %v390_v44 = vsub.f32 %v386_v43, %v388_v42 }
 0x1e0   : > { %v394_v45 = vadd.f32 1e-05, %v390_v44 }
 0x1e2   : > { %684 = vrsqrt.f32 %v394_v45 }
 0x1eb   : > { %v683_v47 = vpop.eup %682 }
 0x1ec   : > { %v397_v49 = vmul.f32 %v683_v47, %v391_v46 }
 0x1ee   : > { %v403_v51 = vmul.f32 %v538_v48, %v397_v49 }
 0x1ef   : > { %v685_v53 = vpop.eup %684 }
 0x1f0   : > { %v409_v54 = vadd.f32 %v539_v50, %v403_v51  ;;  %v398_v55 = vmul.f32 %v685_v53, %v392_v52 }
 0x1f2   : > { %686 = vtanh.f32 %v409_v54  ;;  %v404_v56 = vmul.f32 %v538_v48, %v398_v55 }
 0x1f4   : > { %v410_v57 = vadd.f32 %v539_v50, %v404_v56 }
 0x1f6   : > { %688 = vtanh.f32 %v410_v57 }
 0x1ff   : > { %v687_v58 = vpop.eup %686 }
 0x200   : > { %413 = vst [vmem:[#allocation9] sm:$0xff] %v687_v58 }
 0x203   : > { %v689_v59 = vpop.eup %688 }
 0x204   : > { %414 = vst [vmem:[#allocation9 + $0x8] sm:$0xff] %v689_v59 }
 0x205 PF: > { %p624_p0 = scmp.eq.s32.totalorder %s919_s18, 1  ;;  %s867_s15 = smov [#allocation9]  }
 0x206   : > { %s424_s20 = sshll.u32 %s867_s15, 4  ;;  %s425_s20 = int_to_ptr.vmem [resolvable:$true] %s424_s20 }
 0x207   : > { %s772_s21 = scalar_lea.vmem %s425_s20, 256  ;;  %p779_p7 = scmp.lt.s32.totalorder %s425_s20, %s425_s20 }
 0x208   : > { %p773_p1 = scmp.ne.s32.totalorder %s425_s20, %s772_s21  ;;  %p780_p4 = scmp.lt.s32.totalorder %s772_s21, %s772_s21 }
 0x20a   : > { %p774_p2 = pnand %p773_p1, %p624_p0  ;;  %p781_p6 = por %p780_p4, %p779_p7 }
 0x20c   : > { %p775_p5 = pneg %p774_p2 }
 0x20e   : > { %p782_p9 = pnand %p781_p6, %p775_p5 }
 0x210   : > { %785 = shalt.err (!%p782_p9)
}
 0x211   : > { %s868_s19 = smov 128   ;;  %s869_s30 = smov 8  }
 0x212   : > { %607 = dma.vmem_to_hbm [thread:$0]  (%p624_p0), %s425_s20, 256, %s1061_s3, [#allocation5], %s868_s19, %s868_s19, %s869_s30  }
 0x213   : > { %833 = dma.done.wait (%p624_p0), [#allocation5], 256  }
 0x214   : > { %835 = vsyncadd (%p624_p0), [#allocation5], 4294967040 }
 0x215 PF: > { %s20_s17 = sadd.s32 1, %s858_s17   ;;  %s1075_s7 = smov %s968_s12 }
 0x216   : > { %p17_p10 = scmp.ge.s32.totalorder %s20_s17, 4   ;;  %s1076_s8 = sld [smem:[#allocation14_spill]] }
 0x217   : > { %s1077_s12 = smov %s842_s13  ;;  %s1078_s13 = smov %s846_s14 }
 0x218   : > { %s1079_s14 = smov %s1075_s7  ;;  %s1080_s15 = smov %s854_s16 }
 0x219   :  { %19 = sbr.rel (!%p17_p10) target bundleno = 10 (0xa), region = 95 }
 0x21c   : > { %s1081_s16 = smov %s1076_s8 }
 0x21e   :  { %440 = vsyncpa [#allocation4], 1 }
 0x21f   :  { %442 = vsyncpa [#allocation4 + $0x1], 1 }
 0x220   :  { %443 = vsyncpa [#allocation7], 1 }
 0x221   :  { %445 = vsyncpa [#allocation7 + $0x1], 1 }
 0x222   :  { %446 = vsyncpa [#allocation5], 1 }
 0x223   :  { %448 = vsyncpa [#allocation5 + $0x1], 1 }

</bundles_post_ra>
